<compile_context>
chip_gen: v6e
topology: v6e:2x2x1
jax: 0.10.0
libtpu: 0.0.40
codegen_flags: <defaults>
</compile_context>

<pallas_src>
import jax
import jax.numpy as jnp
from jax.experimental import pallas as pl
from jax.experimental.pallas import tpu as pltpu


def decoder_kernel(ids_ref, emb_ref, w_ref, b_ref, h_ref, c_ref, wfc_ref, bfc_ref,
                   pred_out, h_out, c_out):
    B = ids_ref.shape[0]
    V = emb_ref.shape[0]
    L, _, H = h_ref.shape

    # --- embedding lookup as one-hot matmul (MXU); out-of-range ids give a zero row ---
    ids = ids_ref[...]                                            # (B, 1) int32
    iota = jax.lax.broadcasted_iota(jnp.int32, (B, V), 1)
    onehot = (iota == ids).astype(jnp.float32)                    # (B, V)
    x = jnp.dot(onehot, emb_ref[...],
                preferred_element_type=jnp.float32)               # (B, E), E == H
    # dropout (eval) = identity

    # --- stacked LSTM, single time step; fused gate matmul, gate order [i, f, o, g] ---
    for l in range(L):  # num_layers is small & static -> unrolled
        xh = jnp.concatenate([x, h_ref[l]], axis=-1)              # (B, 2H)
        gates = (jnp.dot(xh, w_ref[l], preferred_element_type=jnp.float32)
                 + b_ref[l])                                      # (B, 4H)
        sig = jax.nn.sigmoid(gates[:, 0:3 * H])                   # one contiguous EUP pass
        i_g = sig[:, 0:H]
        f_g = sig[:, H:2 * H]
        o_g = sig[:, 2 * H:3 * H]
        g_g = jnp.tanh(gates[:, 3 * H:4 * H])
        c_new = f_g * c_ref[l] + i_g * g_g
        h_new = o_g * jnp.tanh(c_new)
        h_out[l] = h_new
        c_out[l] = c_new
        x = h_new

    # --- fc: (B, H) @ (H, Vpad) + b  (lane-dense, unmasked store) ---
    pred_out[...] = (jnp.dot(x, wfc_ref[...], preferred_element_type=jnp.float32)
                     + bfc_ref[...])


def decoder_forward(ids, emb, wih, whh, bih, bhh, h0, c0, wfc, bfc):
    """Takes PyTorch-layout parameters, re-lays them out, runs the Pallas kernel."""
    B = ids.shape[0]
    L, _, H = h0.shape
    E = emb.shape[1]
    assert E == H, "embedding_size must equal hidden_size for stacked (L, 4H, H) weights"
    Vout = wfc.shape[0]
    Vpad = max(128, ((Vout + 127) // 128) * 128)

    def reorder_gates(w):
        # last axis is 4H in PyTorch order [i, f, g, o] -> [i, f, o, g]
        return jnp.concatenate(
            [w[..., 0:2 * H], w[..., 3 * H:4 * H], w[..., 2 * H:3 * H]], axis=-1)

    # Fused, pre-transposed gate weight: (L, 2H, 4H) with rows [Wih^T ; Whh^T].
    wih_t = reorder_gates(jnp.transpose(wih, (0, 2, 1)))          # (L, H, 4H)
    whh_t = reorder_gates(jnp.transpose(whh, (0, 2, 1)))          # (L, H, 4H)
    w_fused = jnp.concatenate([wih_t, whh_t], axis=1)             # (L, 2H, 4H)
    b_fused = reorder_gates(bih + bhh)                            # (L, 1, 4H)

    # FC: pre-transpose and lane-pad to Vpad (>= 128) for unmasked stores.
    wfc_t = jnp.zeros((H, Vpad), jnp.float32).at[:, :Vout].set(wfc.T)
    bfc_p = jnp.zeros((1, Vpad), jnp.float32).at[:, :Vout].set(bfc.reshape(1, Vout))

    vmem = pl.BlockSpec(memory_space=pltpu.MemorySpace.VMEM)
    out_shape = (
        jax.ShapeDtypeStruct((B, Vpad), jnp.float32),
        jax.ShapeDtypeStruct((L, B, H), jnp.float32),
        jax.ShapeDtypeStruct((L, B, H), jnp.float32),
    )
    pred_p, h_new, c_new = pl.pallas_call(
        decoder_kernel,
        out_shape=out_shape,
        in_specs=[vmem] * 8,
        out_specs=(vmem, vmem, vmem),
        # Recurrent state updated in place: h0 -> h_out, c0 -> c_out.
        input_output_aliases={4: 1, 5: 2},
    )(ids.reshape(B, 1).astype(jnp.int32),
      emb, w_fused, b_fused, h0, c0, wfc_t, bfc_p)

    return pred_p[:, :Vout], h_new, c_new


def decoder_reference(ids, emb, wih, whh, bih, bhh, h0, c0, wfc, bfc):
    """Pure-JAX reference mirroring torch semantics (eval-mode dropout)."""
    L, _, H = h0.shape
    x = emb[ids]                                                  # (B, E)
    h_new, c_new = [], []
    for l in range(L):
        gates = x @ wih[l].T + h0[l] @ whh[l].T + bih[l, 0] + bhh[l, 0]
        i_g = jax.nn.sigmoid(gates[:, 0:H])
        f_g = jax.nn.sigmoid(gates[:, H:2 * H])
        g_g = jnp.tanh(gates[:, 2 * H:3 * H])
        o_g = jax.nn.sigmoid(gates[:, 3 * H:4 * H])
        c = f_g * c0[l] + i_g * g_g
        h = o_g * jnp.tanh(c)
        h_new.append(h); c_new.append(c)
        x = h
    pred = x @ wfc.T + bfc[0]
    return pred, jnp.stack(h_new), jnp.stack(c_new)


if __name__ == "__main__":
    # Small shapes consistent with the module's forward.
    B = 8            # batch
    V_in = 64        # input_size  (embedding table rows)
    V_out = 48       # output_size (len(english.vocab))
    E = 32           # embedding_size (== hidden_size so layer weights stack)
    H = 32           # hidden_size
    L = 2            # num_layers

    key = jax.random.PRNGKey(0)
    ks = jax.random.split(key, 9)
    ids = jax.random.randint(ks[0], (B,), 0, V_in, dtype=jnp.int32)
    emb = jax.random.normal(ks[1], (V_in, E), jnp.float32) * 0.1
    wih = jax.random.normal(ks[2], (L, 4 * H, H), jnp.float32) * 0.1
    whh = jax.random.normal(ks[3], (L, 4 * H, H), jnp.float32) * 0.1
    bih = jax.random.normal(ks[4], (L, 1, 4 * H), jnp.float32) * 0.1
    bhh = jax.random.normal(ks[5], (L, 1, 4 * H), jnp.float32) * 0.1
    h0 = jax.random.normal(ks[6], (L, B, H), jnp.float32) * 0.1
    c0 = jax.random.normal(ks[7], (L, B, H), jnp.float32) * 0.1
    wfc = jax.random.normal(ks[8], (V_out, H), jnp.float32) * 0.1
    bfc = jnp.zeros((1, V_out), jnp.float32)

    # Reference first (h0/c0 are aliased/donated into the kernel's state outputs).
    pred_r, h_r, c_r = decoder_reference(ids, emb, wih, whh, bih, bhh, h0, c0, wfc, bfc)
    jax.block_until_ready((pred_r, h_r, c_r))

    pred, h, c = decoder_forward(ids, emb, wih, whh, bih, bhh, h0, c0, wfc, bfc)
    jax.block_until_ready((pred, h, c))

    assert pred.shape == (B, V_out) and h.shape == (L, B, H) and c.shape == (L, B, H)
    assert jnp.allclose(pred, pred_r, atol=1e-5)
    assert jnp.allclose(h, h_r, atol=1e-5)
    assert jnp.allclose(c, c_r, atol=1e-5)
    print("KERNEL_OK")
</pallas_src>

<mosaic_0001>
module attributes {stable_mosaic.version = 11 : i64} {
  func.func @decoder_kernel(%arg0: memref<8x1xi32, #tpu.memory_space<vmem>>, %arg1: memref<64x32xf32, #tpu.memory_space<vmem>>, %arg2: memref<2x64x128xf32, #tpu.memory_space<vmem>>, %arg3: memref<2x1x128xf32, #tpu.memory_space<vmem>>, %arg4: memref<2x8x32xf32, #tpu.memory_space<vmem>>, %arg5: memref<2x8x32xf32, #tpu.memory_space<vmem>>, %arg6: memref<32x128xf32, #tpu.memory_space<vmem>>, %arg7: memref<1x128xf32, #tpu.memory_space<vmem>>, %arg8: memref<8x128xf32, #tpu.memory_space<vmem>>, %arg9: memref<2x8x32xf32, #tpu.memory_space<vmem>>, %arg10: memref<2x8x32xf32, #tpu.memory_space<vmem>>) attributes {dimension_semantics = [], scalar_prefetch = 0 : i64, scratch_operands = 0 : i64, tpu.core_type = #tpu.core_type<tc>} {
    %c0 = arith.constant 0 : index
    %c0_0 = arith.constant 0 : index
    %0 = vector.load %arg0[%c0, %c0_0] : memref<8x1xi32, #tpu.memory_space<vmem>>, vector<8x1xi32>
    %1 = tpu.iota {dimensions = array<i32: 1>} : vector<8x64xi32>
    %2 = vector.broadcast %0 : vector<8x1xi32> to vector<8x64xi32>
    %3 = arith.cmpi eq, %1, %2 : vector<8x64xi32>
    %4 = arith.extui %3 : vector<8x64xi1> to vector<8x64xi32>
    %5 = arith.sitofp %4 : vector<8x64xi32> to vector<8x64xf32>
    %c0_1 = arith.constant 0 : index
    %c0_2 = arith.constant 0 : index
    %6 = vector.load %arg1[%c0_1, %c0_2] : memref<64x32xf32, #tpu.memory_space<vmem>>, vector<64x32xf32>
    %cst = arith.constant dense<0.000000e+00> : vector<8x32xf32>
    %7 = tpu.matmul %5, %6, %cst {dimension_numbers = #tpu.dot_dimension_numbers<[1], [0], [0], [1], [0, 0, 1, 1], [], []>} : vector<8x64xf32>, vector<64x32xf32>, vector<8x32xf32> -> vector<8x32xf32>
    %c0_3 = arith.constant 0 : index
    %c0_4 = arith.constant 0 : index
    %c0_5 = arith.constant 0 : index
    %8 = vector.load %arg4[%c0_3, %c0_4, %c0_5] : memref<2x8x32xf32, #tpu.memory_space<vmem>>, vector<1x8x32xf32>
    %9 = vector.shape_cast %8 : vector<1x8x32xf32> to vector<8x32xf32>
    %10 = tpu.concatenate %7, %9 in 1 : vector<8x32xf32>, vector<8x32xf32> -> vector<8x64xf32>
    %c0_6 = arith.constant 0 : index
    %c0_7 = arith.constant 0 : index
    %c0_8 = arith.constant 0 : index
    %11 = vector.load %arg2[%c0_6, %c0_7, %c0_8] : memref<2x64x128xf32, #tpu.memory_space<vmem>>, vector<1x64x128xf32>
    %12 = vector.shape_cast %11 : vector<1x64x128xf32> to vector<64x128xf32>
    %cst_9 = arith.constant dense<0.000000e+00> : vector<8x128xf32>
    %13 = tpu.matmul %10, %12, %cst_9 {dimension_numbers = #tpu.dot_dimension_numbers<[1], [0], [0], [1], [0, 0, 1, 1], [], []>} : vector<8x64xf32>, vector<64x128xf32>, vector<8x128xf32> -> vector<8x128xf32>
    %c0_10 = arith.constant 0 : index
    %c0_11 = arith.constant 0 : index
    %c0_12 = arith.constant 0 : index
    %14 = vector.load %arg3[%c0_10, %c0_11, %c0_12] : memref<2x1x128xf32, #tpu.memory_space<vmem>>, vector<1x1x128xf32>
    %15 = vector.shape_cast %14 : vector<1x1x128xf32> to vector<1x128xf32>
    %16 = vector.broadcast %15 : vector<1x128xf32> to vector<8x128xf32>
    %17 = arith.addf %13, %16 : vector<8x128xf32>
    %18 = vector.extract_strided_slice %17 {offsets = [0, 0], sizes = [8, 96], strides = [1, 1]} : vector<8x128xf32> to vector<8x96xf32>
    %19 = arith.negf %18 : vector<8x96xf32>
    %20 = math.exp %19 : vector<8x96xf32>
    %cst_13 = arith.constant 1.000000e+00 : f32
    %21 = vector.broadcast %cst_13 : f32 to vector<8x96xf32>
    %22 = arith.addf %21, %20 : vector<8x96xf32>
    %23 = arith.divf %21, %22 : vector<8x96xf32>
    %24 = vector.extract_strided_slice %23 {offsets = [0, 0], sizes = [8, 32], strides = [1, 1]} : vector<8x96xf32> to vector<8x32xf32>
    %25 = vector.extract_strided_slice %23 {offsets = [0, 32], sizes = [8, 32], strides = [1, 1]} : vector<8x96xf32> to vector<8x32xf32>
    %26 = vector.extract_strided_slice %23 {offsets = [0, 64], sizes = [8, 32], strides = [1, 1]} : vector<8x96xf32> to vector<8x32xf32>
    %27 = vector.extract_strided_slice %17 {offsets = [0, 96], sizes = [8, 32], strides = [1, 1]} : vector<8x128xf32> to vector<8x32xf32>
    %28 = math.tanh %27 : vector<8x32xf32>
    %c0_14 = arith.constant 0 : index
    %c0_15 = arith.constant 0 : index
    %c0_16 = arith.constant 0 : index
    %29 = vector.load %arg5[%c0_14, %c0_15, %c0_16] : memref<2x8x32xf32, #tpu.memory_space<vmem>>, vector<1x8x32xf32>
    %30 = vector.shape_cast %29 : vector<1x8x32xf32> to vector<8x32xf32>
    %31 = arith.mulf %25, %30 : vector<8x32xf32>
    %32 = arith.mulf %24, %28 : vector<8x32xf32>
    %33 = arith.addf %31, %32 : vector<8x32xf32>
    %34 = math.tanh %33 : vector<8x32xf32>
    %35 = arith.mulf %26, %34 : vector<8x32xf32>
    %c0_17 = arith.constant 0 : index
    %c0_18 = arith.constant 0 : index
    %c0_19 = arith.constant 0 : index
    %36 = vector.load %arg9[%c0_17, %c0_18, %c0_19] : memref<2x8x32xf32, #tpu.memory_space<vmem>>, vector<1x8x32xf32>
    %37 = vector.shape_cast %36 : vector<1x8x32xf32> to vector<8x32xf32>
    %38 = vector.shape_cast %35 : vector<8x32xf32> to vector<1x8x32xf32>
    tpu.vector_store %arg9[%c0_17, %c0_18, %c0_19], %38 {strides = array<i32>} : memref<2x8x32xf32, #tpu.memory_space<vmem>>, vector<1x8x32xf32>,
    %c0_20 = arith.constant 0 : index
    %c0_21 = arith.constant 0 : index
    %c0_22 = arith.constant 0 : index
    %39 = vector.load %arg10[%c0_20, %c0_21, %c0_22] : memref<2x8x32xf32, #tpu.memory_space<vmem>>, vector<1x8x32xf32>
    %40 = vector.shape_cast %39 : vector<1x8x32xf32> to vector<8x32xf32>
    %41 = vector.shape_cast %33 : vector<8x32xf32> to vector<1x8x32xf32>
    tpu.vector_store %arg10[%c0_20, %c0_21, %c0_22], %41 {strides = array<i32>} : memref<2x8x32xf32, #tpu.memory_space<vmem>>, vector<1x8x32xf32>,
    %c1 = arith.constant 1 : index
    %c0_23 = arith.constant 0 : index
    %c0_24 = arith.constant 0 : index
    %42 = vector.load %arg4[%c1, %c0_23, %c0_24] : memref<2x8x32xf32, #tpu.memory_space<vmem>>, vector<1x8x32xf32>
    %43 = vector.shape_cast %42 : vector<1x8x32xf32> to vector<8x32xf32>
    %44 = tpu.concatenate %35, %43 in 1 : vector<8x32xf32>, vector<8x32xf32> -> vector<8x64xf32>
    %c1_25 = arith.constant 1 : index
    %c0_26 = arith.constant 0 : index
    %c0_27 = arith.constant 0 : index
    %45 = vector.load %arg2[%c1_25, %c0_26, %c0_27] : memref<2x64x128xf32, #tpu.memory_space<vmem>>, vector<1x64x128xf32>
    %46 = vector.shape_cast %45 : vector<1x64x128xf32> to vector<64x128xf32>
    %cst_28 = arith.constant dense<0.000000e+00> : vector<8x128xf32>
    %47 = tpu.matmul %44, %46, %cst_28 {dimension_numbers = #tpu.dot_dimension_numbers<[1], [0], [0], [1], [0, 0, 1, 1], [], []>} : vector<8x64xf32>, vector<64x128xf32>, vector<8x128xf32> -> vector<8x128xf32>
    %c1_29 = arith.constant 1 : index
    %c0_30 = arith.constant 0 : index
    %c0_31 = arith.constant 0 : index
    %48 = vector.load %arg3[%c1_29, %c0_30, %c0_31] : memref<2x1x128xf32, #tpu.memory_space<vmem>>, vector<1x1x128xf32>
    %49 = vector.shape_cast %48 : vector<1x1x128xf32> to vector<1x128xf32>
    %50 = vector.broadcast %49 : vector<1x128xf32> to vector<8x128xf32>
    %51 = arith.addf %47, %50 : vector<8x128xf32>
    %52 = vector.extract_strided_slice %51 {offsets = [0, 0], sizes = [8, 96], strides = [1, 1]} : vector<8x128xf32> to vector<8x96xf32>
    %53 = arith.negf %52 : vector<8x96xf32>
    %54 = math.exp %53 : vector<8x96xf32>
    %cst_32 = arith.constant 1.000000e+00 : f32
    %55 = vector.broadcast %cst_32 : f32 to vector<8x96xf32>
    %56 = arith.addf %55, %54 : vector<8x96xf32>
    %57 = arith.divf %55, %56 : vector<8x96xf32>
    %58 = vector.extract_strided_slice %57 {offsets = [0, 0], sizes = [8, 32], strides = [1, 1]} : vector<8x96xf32> to vector<8x32xf32>
    %59 = vector.extract_strided_slice %57 {offsets = [0, 32], sizes = [8, 32], strides = [1, 1]} : vector<8x96xf32> to vector<8x32xf32>
    %60 = vector.extract_strided_slice %57 {offsets = [0, 64], sizes = [8, 32], strides = [1, 1]} : vector<8x96xf32> to vector<8x32xf32>
    %61 = vector.extract_strided_slice %51 {offsets = [0, 96], sizes = [8, 32], strides = [1, 1]} : vector<8x128xf32> to vector<8x32xf32>
    %62 = math.tanh %61 : vector<8x32xf32>
    %c1_33 = arith.constant 1 : index
    %c0_34 = arith.constant 0 : index
    %c0_35 = arith.constant 0 : index
    %63 = vector.load %arg5[%c1_33, %c0_34, %c0_35] : memref<2x8x32xf32, #tpu.memory_space<vmem>>, vector<1x8x32xf32>
    %64 = vector.shape_cast %63 : vector<1x8x32xf32> to vector<8x32xf32>
    %65 = arith.mulf %59, %64 : vector<8x32xf32>
    %66 = arith.mulf %58, %62 : vector<8x32xf32>
    %67 = arith.addf %65, %66 : vector<8x32xf32>
    %68 = math.tanh %67 : vector<8x32xf32>
    %69 = arith.mulf %60, %68 : vector<8x32xf32>
    %c1_36 = arith.constant 1 : index
    %c0_37 = arith.constant 0 : index
    %c0_38 = arith.constant 0 : index
    %70 = vector.load %arg9[%c1_36, %c0_37, %c0_38] : memref<2x8x32xf32, #tpu.memory_space<vmem>>, vector<1x8x32xf32>
    %71 = vector.shape_cast %70 : vector<1x8x32xf32> to vector<8x32xf32>
    %72 = vector.shape_cast %69 : vector<8x32xf32> to vector<1x8x32xf32>
    tpu.vector_store %arg9[%c1_36, %c0_37, %c0_38], %72 {strides = array<i32>} : memref<2x8x32xf32, #tpu.memory_space<vmem>>, vector<1x8x32xf32>,
    %c1_39 = arith.constant 1 : index
    %c0_40 = arith.constant 0 : index
    %c0_41 = arith.constant 0 : index
    %73 = vector.load %arg10[%c1_39, %c0_40, %c0_41] : memref<2x8x32xf32, #tpu.memory_space<vmem>>, vector<1x8x32xf32>
    %74 = vector.shape_cast %73 : vector<1x8x32xf32> to vector<8x32xf32>
    %75 = vector.shape_cast %67 : vector<8x32xf32> to vector<1x8x32xf32>
    tpu.vector_store %arg10[%c1_39, %c0_40, %c0_41], %75 {strides = array<i32>} : memref<2x8x32xf32, #tpu.memory_space<vmem>>, vector<1x8x32xf32>,
    %c0_42 = arith.constant 0 : index
    %c0_43 = arith.constant 0 : index
    %76 = vector.load %arg6[%c0_42, %c0_43] : memref<32x128xf32, #tpu.memory_space<vmem>>, vector<32x128xf32>
    %cst_44 = arith.constant dense<0.000000e+00> : vector<8x128xf32>
    %77 = tpu.matmul %69, %76, %cst_44 {dimension_numbers = #tpu.dot_dimension_numbers<[1], [0], [0], [1], [0, 0, 1, 1], [], []>} : vector<8x32xf32>, vector<32x128xf32>, vector<8x128xf32> -> vector<8x128xf32>
    %c0_45 = arith.constant 0 : index
    %c0_46 = arith.constant 0 : index
    %78 = vector.load %arg7[%c0_45, %c0_46] : memref<1x128xf32, #tpu.memory_space<vmem>>, vector<1x128xf32>
    %79 = vector.broadcast %78 : vector<1x128xf32> to vector<8x128xf32>
    %80 = arith.addf %77, %79 : vector<8x128xf32>
    %c0_47 = arith.constant 0 : index
    %c0_48 = arith.constant 0 : index
    %81 = vector.load %arg8[%c0_47, %c0_48] : memref<8x128xf32, #tpu.memory_space<vmem>>, vector<8x128xf32>
    tpu.vector_store %arg8[%c0_47, %c0_48], %80 {strides = array<i32>} : memref<8x128xf32, #tpu.memory_space<vmem>>, vector<8x128xf32>,
    return
  }
}

</mosaic_0001>

<bundles_post_ra>
// kernel: tpu_custom_call.1
= control target key start
LH: loop header
LB: loop body
LE: loop exit
PB: predicated region body
PF: predicated region fallthrough
CT: control target
= control target key end

     0   :  { %16 = vsyncpa [#allocation3], 0  ;;  %s1068_s0 = inlined_call_operand.vmem [shape: s32[8,1], index: 0, kind: input, shape index: {}]   ;;  %s1069_s1 = inlined_call_operand.vmem [shape: f32[64,32], index: 1, kind: input, shape index: {}]   ;;  %s1070_s2 = inlined_call_operand.vmem [shape: f32[2,64,128], index: 2, kind: input, shape index: {}]   ;;  %s1071_s3 = inlined_call_operand.vmem [shape: f32[2,1,128], index: 3, kind: input, shape index: {}]   ;;  %s1072_s4 = inlined_call_operand.hbm [shape: f32[2,8,32], index: 4, kind: input, shape index: {}, may-alias: {4,9}]   ;;  %s1073_s5 = inlined_call_operand.hbm [shape: f32[2,8,32], index: 5, kind: input, shape index: {}, may-alias: {5,10}]   ;;  %s1074_s6 = inlined_call_operand.vmem [shape: f32[32,128], index: 6, kind: input, shape index: {}]   ;;  %s1075_s7 = inlined_call_operand.vmem [shape: f32[1,128], index: 7, kind: input, shape index: {}]   ;;  %s1076_s8 = inlined_call_operand.hbm [shape: f32[8,128], index: 8, kind: output, shape index: {0}]   ;;  %s1077_s9 = inlined_call_operand.hbm [shape: f32[2,8,32], index: 9, kind: output, shape index: {1}, may-alias: {4,9}]   ;;  %s1078_s10 = inlined_call_operand.hbm [shape: f32[2,8,32], index: 10, kind: output, shape index: {2}, may-alias: {5,10}]  }
   0x1   :  { %17 = vsyncpa [#allocation6], 0 }
   0x2   :  { %18 = vsyncpa [#allocation4], 0 }
   0x3   :  { %19 = vsyncpa [#allocation9], 0  ;;  %s814_s13 = smov [#allocation2]  }
   0x4   :  { %s33_s14 = sshll.u32 %s814_s13, 4  ;;  %s34_s14 = int_to_ptr.vmem [resolvable:$true] %s33_s14 }
   0x5   :  { %s714_s15 = scalar_lea.vmem %s34_s14, 256  ;;  %p719_p1 = scmp.lt.s32.totalorder %s34_s14, %s34_s14 }
   0x6   :  { %p715_p0 = scmp.ne.s32.totalorder %s34_s14, %s714_s15  ;;  %p720_p2 = scmp.lt.s32.totalorder %s714_s15, %s714_s15 }
   0x8   :  { %p721_p3 = por %p720_p2, %p719_p1 }
   0xa   :  { %p722_p4 = pnand %p721_p3, %p715_p0 }
   0xc   :  { %725 = shalt.err (!%p722_p4)
}
   0xd   :  { %s815_s16 = smov 128   ;;  %s816_s17 = smov 8  }
   0xe   :  { %39 = dma.hbm_to_vmem [thread:$0]  %s1072_s4, 256, %s34_s14, [#allocation3], %s815_s16, %s815_s16, %s816_s17  }
   0xf   :  { %s817_s20 = smov [#allocation5]  }
  0x10   :  { %s45_s21 = sshll.u32 %s817_s20, 4  ;;  %s46_s21 = int_to_ptr.vmem [resolvable:$true] %s45_s21 }
  0x11   :  { %s734_s22 = scalar_lea.vmem %s46_s21, 256  ;;  %p739_p6 = scmp.lt.s32.totalorder %s46_s21, %s46_s21 }
  0x12   :  { %p735_p5 = scmp.ne.s32.totalorder %s46_s21, %s734_s22  ;;  %p740_p7 = scmp.lt.s32.totalorder %s734_s22, %s734_s22 }
  0x14   :  { %p741_p8 = por %p740_p7, %p739_p6 }
  0x16   :  { %p742_p9 = pnand %p741_p8, %p735_p5 }
  0x18   :  { %745 = shalt.err (!%p742_p9)
}
  0x19   :  { %51 = dma.hbm_to_vmem [thread:$0]  %s1073_s5, 256, %s46_s21, [#allocation6], %s815_s16, %s815_s16, %s816_s17  }
  0x1a   :  { %806 = dma.done.wait [#allocation3], 256  }
  0x1b   :  { %807 = vsyncadd [#allocation3], 4294967040 }
  0x1c   :  { %808 = dma.done.wait [#allocation6], 256  }
  0x1d   :  { %809 = vsyncadd [#allocation6], 4294967040  ;;  %v818_v0 = vmov 0   ;;  %v819_v1 = vmov 0.0   ;;  %vm820_vm0 = vmmov 0   ;;  %v62_v2 = vld [vmem:[%s1068_s0] sm:$0xff]  ;;  %v63_v19 = vlaneseq }
  0x1e   :  { %689 = vset.pattern.permute.xlu0 %v818_v0  ;;  %608 = vmatprep.subr.mxu0 %v819_v1  ;;  %v78_v3 = vld [vmem:[%s1069_s1 + $0x38] sm:$0xff]  ;;  %v77_v4 = vld [vmem:[%s1069_s1 + $0x30] sm:$0xff]  ;;  %v76_v5 = vld [vmem:[%s1069_s1 + $0x28] sm:$0xff]  ;;  %s821_s18 = smov 32   ;;  %vm79_vm1 = vcmask 523264   ;;  %vm158_vm3 = vcmask 261120  }
  0x1f   :  { %627 = vmatprep.subr.mxu1 %v819_v1  ;;  %624 = vmatprep.mubr.msk.f32.mxu0 %vm820_vm0, %v819_v1  ;;  %v153_v6 = vld [vmem:[#allocation2] sm:$0xff]  ;;  %v167_v7 = vld [vmem:[%s1070_s2 + $0x38] sm:$0xff]  ;;  %v166_v9 = vld [vmem:[%s1070_s2 + $0x30] sm:$0xff]  ;;  %v64_v20 = vand.u32 127, %v63_v19  ;;  %s822_s13 = smov 64   ;;  %s823_s24 = smov 96  }
  0x20   :  { %643 = vmatprep.mubr.msk.f32.mxu1 %vm820_vm0, %v819_v1  ;;  %66 = vperm.xlu0 %689, %v62_v2   ;;  %v75_v8 = vld [vmem:[%s1069_s1 + $0x20] sm:$0xff]  ;;  %v74_v10 = vld [vmem:[%s1069_s1 + $0x18] sm:$0xff]  ;;  %v165_v11 = vld [vmem:[%s1070_s2 + $0x28] sm:$0xff] }
  0x21   :  { %609 = vmatpush3.msra.mxu0 %v78_v3  ;;  %628 = vmatpush3.msra.mxu1 %v167_v7  ;;  %v73_v12 = vld [vmem:[%s1069_s1 + $0x10] sm:$0xff]  ;;  %v164_v13 = vld [vmem:[%s1070_s2 + $0x20] sm:$0xff]  ;;  %v72_v14 = vld [vmem:[%s1069_s1 + $0x8] sm:$0xff] }
  0x22   :  { %610 = vmatprep.subr.mxu0 %v819_v1  ;;  %629 = vmatprep.subr.mxu1 %v819_v1  ;;  %v163_v15 = vld [vmem:[%s1070_s2 + $0x18] sm:$0xff]  ;;  %v71_v16 = vld [vmem:[%s1069_s1] sm:$0xff]  ;;  %v162_v17 = vld [vmem:[%s1070_s2 + $0x10] sm:$0xff] }
  0x23   :  { %611 = vmatpush3.msra.mxu0 %v77_v4  ;;  %630 = vmatpush3.msra.mxu1 %v166_v9  ;;  %v161_v18 = vld [vmem:[%s1070_s2 + $0x8] sm:$0xff]  ;;  %v160_v23 = vld [vmem:[%s1070_s2] sm:$0xff]  ;;  %v255_v33 = vld [vmem:[#allocation5] sm:$0xff] }
  0x24   :  { %612 = vmatprep.subr.mxu0 %v819_v1  ;;  %155 = vrot.lane.b32.xlu0 %v153_v6, %s821_s18  ;;  %v559_v28 = vld [vmem:[%s1071_s3] ss:$0 sm:$0xff]  ;;  %v569_v44 = vld [vmem:[%s1070_s2 + $0x78] sm:$0xff]  ;;  %v568_v45 = vld [vmem:[%s1070_s2 + $0x70] sm:$0xff] }
  0x25   :  { %613 = vmatpush3.msra.mxu0 %v76_v5  ;;  %631 = vmatprep.subr.mxu1 %v819_v1  ;;  %v567_v46 = vld [vmem:[%s1070_s2 + $0x68] sm:$0xff]  ;;  %v566_v47 = vld [vmem:[%s1070_s2 + $0x60] sm:$0xff]  ;;  %v565_v48 = vld [vmem:[%s1070_s2 + $0x58] sm:$0xff] }
  0x26   :  { %614 = vmatprep.subr.mxu0 %v819_v1  ;;  %632 = vmatpush3.msra.mxu1 %v165_v11  ;;  %v564_v49 = vld [vmem:[%s1070_s2 + $0x50] sm:$0xff]  ;;  %v563_v51 = vld [vmem:[%s1070_s2 + $0x48] sm:$0xff]  ;;  %v562_v53 = vld [vmem:[%s1070_s2 + $0x40] sm:$0xff] }
  0x27   :  { %615 = vmatpush3.msra.mxu0 %v75_v8  ;;  %633 = vmatprep.subr.mxu1 %v819_v1  ;;  %v288_v52 = vld [vmem:[#allocation2 + $0x8] sm:$0xff]  ;;  %v392_v54 = vld [vmem:[#allocation5 + $0x8] sm:$0xff]  ;;  %v571_v60 = vld [vmem:[%s1071_s3 + $0x1] ss:$0 sm:$0xff] }
  0x28   :  { %616 = vmatprep.subr.mxu0 %v819_v1  ;;  %634 = vmatpush3.msra.mxu1 %v164_v13  ;;  %v428_v13 = vld [vmem:[%s1074_s6 + $0x10] sm:$0xff] }
  0x29   :  { %617 = vmatpush3.msra.mxu0 %v74_v10  ;;  %635 = vmatprep.subr.mxu1 %v819_v1 }
  0x2a   :  { %618 = vmatprep.subr.mxu0 %v819_v1  ;;  %636 = vmatpush3.msra.mxu1 %v163_v15  ;;  %v426_v15 = vld [vmem:[%s1074_s6] sm:$0xff] }
  0x2b   :  { %619 = vmatpush3.msra.mxu0 %v73_v12  ;;  %637 = vmatprep.subr.mxu1 %v819_v1  ;;  %v429_v12 = vld [vmem:[%s1074_s6 + $0x18] sm:$0xff] }
  0x2c   :  { %620 = vmatprep.subr.mxu0 %v819_v1  ;;  %638 = vmatpush3.msra.mxu1 %v162_v17 }
  0x2d   :  { %621 = vmatpush3.msra.mxu0 %v72_v14  ;;  %639 = vmatprep.subr.mxu1 %v819_v1  ;;  %v427_v14 = vld [vmem:[%s1074_s6 + $0x8] sm:$0xff]  ;;  %s824_s6 = smov [#allocation8]  }
  0x2e   :  { %622 = vmatprep.subr.mxu0 %v819_v1  ;;  %640 = vmatpush3.msra.mxu1 %v161_v18 }
  0x2f   :  { %623 = vmatpush3.msra.mxu0 %v71_v16  ;;  %641 = vmatprep.subr.mxu1 %v819_v1 }
  0x30   :  { %646 = vmatprep.subr.mxu0 %v819_v1  ;;  %642 = vmatpush3.msra.mxu1 %v160_v23 }
  0x31   :  { %665 = vmatprep.subr.mxu1 %v819_v1 }
  0x9b   :  { %v67_v21 = vpop.permute.xlu0 %66 }
  0x9c   :  { %vm68_vm2 = vcmp.eq.s32.totalorder %v64_v20, %v67_v21 }
  0x9d   :  { %v557_v22 = vsel %vm68_vm2, 1.0, %v819_v1 }
  0x9e   :  { %625 = vmatmul.mubr.msk.f32.vlgmr.msra.gmra.mxu0 %vm79_vm1, %v557_v22 }
  0x9f   :  { %662 = vmatprep.mubr.msk.f32.mxu0 %vm820_vm0, %v819_v1  ;;  %v156_v24 = vpop.permute.xlu0 %155  ;;  %647 = vmatpush3.msra.mxu0 %v569_v44 }
  0xa0   :  { %648 = vmatprep.subr.mxu0 %v819_v1 }
  0xa1   :  { %649 = vmatpush3.msra.mxu0 %v568_v45 }
  0xa2   :  { %650 = vmatprep.subr.mxu0 %v819_v1 }
  0xa3   :  { %651 = vmatpush3.msra.mxu0 %v567_v46 }
  0xa4   :  { %652 = vmatprep.subr.mxu0 %v819_v1 }
  0xa5   :  { %653 = vmatpush3.msra.mxu0 %v566_v47 }
  0xa6   :  { %654 = vmatprep.subr.mxu0 %v819_v1 }
  0xa7   :  { %655 = vmatpush3.msra.mxu0 %v565_v48 }
  0xa8   :  { %656 = vmatprep.subr.mxu0 %v819_v1 }
  0xa9   :  { %657 = vmatpush3.msra.mxu0 %v564_v49 }
  0xaa   :  { %658 = vmatprep.subr.mxu0 %v819_v1 }
  0xab   :  { %659 = vmatpush3.msra.mxu0 %v563_v51 }
  0xac   :  { %660 = vmatprep.subr.mxu0 %v819_v1 }
  0xad   :  { %661 = vmatpush3.msra.mxu0 %v562_v53 }
 0x15e   :  { %v149_v25 = vpop.f32.mrf.mxu0 }
 0x15f   :  { %v159_v26 = vsel %vm158_vm3, %v149_v25, %v156_v24 }
 0x160   :  { %v626_v27 = vpop.f32.mrf.mxu0  ;;  %644 = vmatmul.mubr.msk.f32.vlgmr.msra.gmra.mxu1 %vm79_vm1, %v159_v26 }
 0x161   :  { %673 = vmatprep.mubr.msk.f32.mxu1 %vm820_vm0, %v819_v1  ;;  %666 = vmatpush3.msra.mxu1 %v429_v12 }
 0x162   :  { %667 = vmatprep.subr.mxu1 %v819_v1 }
 0x163   :  { %668 = vmatpush3.msra.mxu1 %v428_v13 }
 0x164   :  { %669 = vmatprep.subr.mxu1 %v819_v1 }
 0x165   :  { %670 = vmatpush3.msra.mxu1 %v427_v14 }
 0x166   :  { %671 = vmatprep.subr.mxu1 %v819_v1 }
 0x167   :  { %672 = vmatpush3.msra.mxu1 %v426_v15 }
 0x220   :  { %v244_v29 = vpop.f32.mrf.mxu1 }
 0x221   :  { %v245_v30 = vadd.f32 %v559_v28, %v244_v29 }
 0x222   :  { %v645_v31 = vpop.f32.mrf.mxu1 }
 0x223   :  { %690 = vtanh.f32 %v245_v30  ;;  %v561_v34 = vmul.f32 -1.442695, %v245_v30 }
 0x225   :  { %692 = vpow2.f32 %v561_v34 }
 0x230   :  { %v691_v32 = vpop.eup %690 }
 0x231   :  { %262 = vrot.lane.b32.xlu1 %v691_v32, %s821_s18 }
 0x232   :  { %v693_v35 = vpop.eup %692 }
 0x233   :  { %v251_v36 = vadd.f32 1.0, %v693_v35 }
 0x235   :  { %257 = vrot.lane.b32.xlu1 %v255_v33, %s821_s18  ;;  %694 = vrcp.f32 %v251_v36 }
 0x242   :  { %v695_v37 = vpop.eup %694 }
 0x2a3   :  { %v263_v38 = vpop.permute.xlu1 %262 }
 0x2a4   :  { %v265_v39 = vmul.f32 %v695_v37, %v263_v38 }
 0x2a6   :  { %267 = vrot.lane.b32.xlu0 %v265_v39, %s821_s18 }
 0x2a7   :  { %v258_v40 = vpop.permute.xlu1 %257 }
 0x2a8   :  { %v260_v41 = vmul.f32 %v695_v37, %v258_v40 }
 0x318   :  { %v268_v42 = vpop.permute.xlu0 %267 }
 0x319   :  { %v982_v43 = vadd.f32 %v268_v42, %v260_v41 }
 0x31b   :  { %696 = vtanh.f32 %v982_v43 }
 0x328   :  { %v697_v50 = vpop.eup %696 }
 0x329   :  { %273 = vrot.lane.b32.xlu1 %v697_v50, %s821_s18 }
 0x32d   :  { %290 = vrot.lane.b32.xlu1 %v288_v52, %s821_s18 }
 0x331   :  { %394 = vrot.lane.b32.xlu1 %v392_v54, %s821_s18 }
 0x39b   :  { %v274_v55 = vpop.permute.xlu1 %273 }
 0x39c   :  { %v276_v56 = vmul.f32 %v695_v37, %v274_v55 }
 0x39e   :  { %278 = vrot.lane.b32.xlu0 %v276_v56, %s822_s13 }
 0x39f   :  { %v291_v57 = vpop.permute.xlu1 %290 }
 0x3a3   :  { %v395_v8 = vpop.permute.xlu1 %394 }
 0x410   :  { %v279_v58 = vpop.permute.xlu0 %278 }
 0x411   :  { %281 = vst.msk [vmem:[#allocation8] sm:$0xff] %vm158_vm3, %v279_v58  ;;  %v293_v59 = vsel %vm158_vm3, %v279_v58, %v291_v57 }
 0x412   :  { %663 = vmatmul.mubr.msk.f32.vlgmr.msra.gmra.mxu0 %vm79_vm1, %v293_v59 }
 0x4d2   :  { %v380_v61 = vpop.f32.mrf.mxu0 }
 0x4d3   :  { %v381_v62 = vadd.f32 %v571_v60, %v380_v61 }
 0x4d4   :  { %v664_v63 = vpop.f32.mrf.mxu0 }
 0x4d5   :  { %698 = vtanh.f32 %v381_v62  ;;  %v573_v2 = vmul.f32 -1.442695, %v381_v62 }
 0x4d7   :  { %700 = vpow2.f32 %v573_v2 }
 0x4e2   :  { %v699_v0 = vpop.eup %698 }
 0x4e3   :  { %399 = vrot.lane.b32.xlu0 %v699_v0, %s821_s18 }
 0x4e4   :  { %v701_v3 = vpop.eup %700 }
 0x4e5   :  { %v387_v4 = vadd.f32 1.0, %v701_v3 }
 0x4e7   :  { %702 = vrcp.f32 %v387_v4 }
 0x4f4   :  { %v703_v5 = vpop.eup %702 }
 0x4f5   :  { %v397_v9 = vmul.f32 %v703_v5, %v395_v8 }
 0x555   :  { %v400_v6 = vpop.permute.xlu0 %399 }
 0x556   :  { %v402_v7 = vmul.f32 %v703_v5, %v400_v6 }
 0x558   :  { %404 = vrot.lane.b32.xlu0 %v402_v7, %s821_s18 }
 0x5ca   :  { %v405_v10 = vpop.permute.xlu0 %404 }
 0x5cb   :  { %v407_v11 = vadd.f32 %v405_v10, %v397_v9 }
 0x5cd   :  { %704 = vtanh.f32 %v407_v11 }
 0x5da   :  { %v705_v16 = vpop.eup %704 }
 0x5db   :  { %410 = vrot.lane.b32.xlu1 %v705_v16, %s821_s18  ;;  %s525_s18 = sshll.u32 %s824_s6, 4  ;;  %s526_s18 = int_to_ptr.vmem [resolvable:$true] %s525_s18 }
 0x5dc   :  { %s746_s4 = scalar_lea.vmem %s526_s18, 256  ;;  %p751_p11 = scmp.lt.s32.totalorder %s526_s18, %s526_s18 }
 0x5dd   :  { %p747_p10 = scmp.ne.s32.totalorder %s526_s18, %s746_s4  ;;  %p752_p12 = scmp.lt.s32.totalorder %s746_s4, %s746_s4 }
 0x5df   :  { %283 = vrot.lane.b32.xlu1 %v982_v43, %s823_s24  ;;  %p753_p13 = por %p752_p12, %p751_p11 }
 0x5e1   :  { %p754_p0 = pnand %p753_p13, %p747_p10 }
 0x64d   :  { %v411_v17 = vpop.permute.xlu1 %410 }
 0x64e   :  { %v413_v18 = vmul.f32 %v703_v5, %v411_v17 }
 0x650   :  { %415 = vrot.lane.b32.xlu0 %v413_v18, %s822_s13 }
 0x651   :  { %v284_v19 = vpop.permute.xlu1 %283 }
 0x652   :  { %286 = vst.msk [vmem:[#allocation10] sm:$0xff] %vm158_vm3, %v284_v19 }
 0x654   :  { %421 = vrot.lane.b32.xlu0 %v407_v11, %s823_s24 }
 0x6c2   :  { %v416_v20 = vpop.permute.xlu0 %415 }
 0x6c3   :  { %419 = vst.msk [vmem:[#allocation8 + $0x8] sm:$0xff] %vm158_vm3, %v416_v20  ;;  %674 = vmatmul.mubr.msk.f32.vlgmr.msra.gmra.mxu1 %vm158_vm3, %v416_v20 }
 0x6c6   :  { %v422_v1 = vpop.permute.xlu0 %421 }
 0x6c7   :  { %425 = vst.msk [vmem:[#allocation10 + $0x8] sm:$0xff] %vm158_vm3, %v422_v1 }
 0x6c8   :  { %757 = shalt.err (!%p754_p0)
}
 0x6c9   :  { %531 = dma.vmem_to_hbm [thread:$0]  %s526_s18, 256, %s1077_s9, [#allocation9], %s815_s16, %s815_s16, %s816_s17  }
 0x6ca   :  { %s825_s26 = smov [#allocation10]  }
 0x6cb   :  { %s537_s27 = sshll.u32 %s825_s26, 4  ;;  %s538_s27 = int_to_ptr.vmem [resolvable:$true] %s537_s27 }
 0x6cc   :  { %s766_s28 = scalar_lea.vmem %s538_s27, 256  ;;  %p771_p2 = scmp.lt.s32.totalorder %s538_s27, %s538_s27 }
 0x6cd   :  { %p767_p1 = scmp.ne.s32.totalorder %s538_s27, %s766_s28  ;;  %p772_p3 = scmp.lt.s32.totalorder %s766_s28, %s766_s28 }
 0x6cf   :  { %p773_p4 = por %p772_p3, %p771_p2 }
 0x6d1   :  { %p774_p5 = pnand %p773_p4, %p767_p1 }
 0x6d3   :  { %777 = shalt.err (!%p774_p5)
}
 0x6d4   :  { %543 = dma.vmem_to_hbm [thread:$0]  %s538_s27, 256, %s1078_s10, [#allocation9], %s815_s16, %s815_s16, %s816_s17  }
 0x6d5   :  { %v574_v21 = vld [vmem:[%s1075_s7] ss:$0 sm:$0xff]  ;;  %s826_s9 = smov [#allocation7]  }
 0x6d6   :  { %s516_s12 = sshll.u32 %s826_s9, 4  ;;  %s517_s12 = int_to_ptr.vmem [resolvable:$true] %s516_s12 }
 0x6d7   :  { %s786_s13 = scalar_lea.vmem %s517_s12, 128  ;;  %p791_p7 = scmp.lt.s32.totalorder %s517_s12, %s517_s12 }
 0x6d8   :  { %p787_p6 = scmp.ne.s32.totalorder %s517_s12, %s786_s13  ;;  %p792_p8 = scmp.lt.s32.totalorder %s786_s13, %s786_s13 }
 0x6da   :  { %p793_p9 = por %p792_p8, %p791_p7 }
 0x6dc   :  { %p794_p10 = pnand %p793_p9, %p787_p6 }
 0x783   :  { %v505_v22 = vpop.f32.mrf.mxu1 }
 0x784   :  { %v506_v23 = vadd.f32 %v574_v21, %v505_v22 }
 0x785   :  { %v675_v24 = vpop.f32.mrf.mxu1 }
 0x786   :  { %509 = vst [vmem:[#allocation7] sm:$0xff] %v506_v23 }
 0x787   :  { %797 = shalt.err (!%p794_p10)
}
 0x788   :  { %519 = dma.vmem_to_hbm [thread:$0]  %s517_s12, 128, %s1076_s8, [#allocation4]  }
 0x789   :  { %810 = dma.done.wait [#allocation4], 128  }
 0x78a   :  { %811 = vsyncadd [#allocation4], 4294967168 }
 0x78b   :  { %812 = dma.done.wait [#allocation9], 512  }
 0x78c   :  { %813 = vsyncadd [#allocation9], 4294966784 }
 0x78d   :  { %553 = vsyncpa [#allocation3], 1 }
 0x78e   :  { %554 = vsyncpa [#allocation6], 1 }
 0x78f   :  { %555 = vsyncpa [#allocation4], 1 }
 0x790   :  { %556 = vsyncpa [#allocation9], 1 }

</bundles_post_ra>
